<compile_context>
chip_gen: v5e
topology: v5e:2x2
jax: 0.10.0
libtpu: 0.0.40
codegen_flags: <defaults>
</compile_context>

<pallas_src>
import jax
import jax.numpy as jnp
from jax.experimental import pallas as pl
from jax.experimental.pallas import tpu as pltpu


def _round_up(v, m):
    return (v + m - 1) // m * m


def _vmem_limit_bytes():
    """Generation-aware VMEM limit with headroom under the physical cap."""
    cap = 128 * 1024 * 1024
    try:
        cap = int(pltpu.get_tpu_info().vmem_capacity_bytes)  # v7x: 64 MiB/TC
    except Exception:
        pass
    return int(max(32 * 1024 * 1024,
                   min(cap - 16 * 1024 * 1024, 100 * 1024 * 1024)))


def _pick_node_tile(n, max_tile=512):
    """Row/contraction tile for the node dimension.

    Prefer large tiles (streaming efficiency, fewer H re-reads), but keep at
    least 2 row tiles when possible so the leading "parallel" grid axis can be
    split across v7x's two TensorCores.
    """
    t = min(max_tile, _round_up(n, 128))
    while t > 128 and _round_up(n, t) // t < 2:
        t = max(128, _round_up(t // 2, 128))
    return t


# ---------------------------------------------------------------------------
# Generic tiled  out = A @ B + bias  kernel (bias broadcast over rows).
# Used twice: H = X @ W (+0)  and  OUT = A_hat @ H (+bias).
# ---------------------------------------------------------------------------
def _make_matmul_bias_kernel(*, tk, tn, resident_b, use_acc):
    """Kernel factory.

    resident_b: B was passed as one full-array VMEM block (constant index_map)
                and is sliced in-kernel by (k, j).
    use_acc:    accumulate in a f32 VMEM scratch (needed when the output dtype
                is not f32); otherwise accumulate directly into o_ref.
    """

    def kernel(a_ref, b_ref, bias_ref, o_ref, *scratch):
        k = pl.program_id(2)

        if resident_b:
            j = pl.program_id(1)
            r0 = pl.multiple_of(k * tk, tk)
            c0 = pl.multiple_of(j * tn, tn)
            b_blk = b_ref[pl.ds(r0, tk), pl.ds(c0, tn)]
        else:
            b_blk = b_ref[...]

        part = jnp.dot(a_ref[...], b_blk, preferred_element_type=jnp.float32)

        if use_acc:
            acc_ref = scratch[0]

            @pl.when(k == 0)
            def _():
                acc_ref[...] = jnp.zeros_like(acc_ref)

            acc_ref[...] += part

            @pl.when(k == pl.num_programs(2) - 1)
            def _():
                o_ref[...] = (acc_ref[...]
                              + bias_ref[...].astype(jnp.float32)
                              ).astype(o_ref.dtype)
        else:
            # f32 output: the output block is resident across k, so accumulate
            # into it directly (saves tm*tn*4 bytes of VMEM scratch).
            @pl.when(k == 0)
            def _():
                o_ref[...] = jnp.broadcast_to(
                    bias_ref[...].astype(o_ref.dtype), o_ref.shape)

            o_ref[...] += part.astype(o_ref.dtype)

    return kernel


def matmul_bias_pallas(a, b, bias, *, out_dtype=jnp.float32,
                       tm=512, tn=256, tk=512, b_resident=None,
                       vmem_limit=None):
    """Tiled TPU matmul with bias:  (a @ b) + bias[None, :].

    Returns the zero-padded (Mp, Np) result; callers slice if they passed
    unpadded logical shapes.  If the operands are already padded to the tile
    grid (and in the right dtype) no extra HBM copies are made here.
    """
    M, K = a.shape
    K2, N = b.shape
    assert K == K2
    if vmem_limit is None:
        vmem_limit = _vmem_limit_bytes()

    sub_a = 16 if a.dtype == jnp.bfloat16 else 8
    tm = max(sub_a, min(tm, _round_up(M, sub_a)))
    tk = max(128, min(tk, _round_up(K, 128)))
    tn = max(128, min(tn, _round_up(N, 128)))
    Mp, Kp, Np = _round_up(M, tm), _round_up(K, tk), _round_up(N, tn)

    # Pad only when the caller did not already hand us a padded array.
    a_p = a if a.shape == (Mp, Kp) else (
        jnp.zeros((Mp, Kp), a.dtype).at[:M, :K].set(a))
    b_p = b if b.shape == (Kp, Np) else (
        jnp.zeros((Kp, Np), b.dtype).at[:K, :N].set(b))
    bias32 = bias.astype(jnp.float32)
    bias_p = (bias32.reshape(1, Np) if bias32.shape[0] == Np else
              jnp.zeros((1, Np), jnp.float32).at[0, :N].set(bias32))

    if b_resident is None:
        # Keep B resident (single DMA, no per-row-tile re-stream) when it,
        # including a possible second pipeline buffer, comfortably fits VMEM.
        b_bytes = Kp * Np * b_p.dtype.itemsize
        b_resident = 2 * b_bytes <= min(vmem_limit // 3, 16 * 1024 * 1024)

    use_acc = jnp.dtype(out_dtype) != jnp.dtype(jnp.float32)

    grid = (Mp // tm, Np // tn, Kp // tk)
    kernel = _make_matmul_bias_kernel(tk=tk, tn=tn,
                                      resident_b=b_resident, use_acc=use_acc)

    b_spec = (pl.BlockSpec((Kp, Np), lambda i, j, k: (0, 0)) if b_resident
              else pl.BlockSpec((tk, tn), lambda i, j, k: (k, j)))
    in_specs = [
        pl.BlockSpec((tm, tk), lambda i, j, k: (i, k)),   # A tile
        b_spec,                                           # B tile / resident B
        pl.BlockSpec((1, tn), lambda i, j, k: (0, j)),    # bias tile
    ]
    out_specs = pl.BlockSpec((tm, tn), lambda i, j, k: (i, j))
    scratch = (pltpu.VMEM((tm, tn), jnp.float32),) if use_acc else ()

    n_b_reads = 1 if b_resident else (Mp // tm)
    cost = pl.CostEstimate(
        flops=2 * Mp * Np * Kp,
        transcendentals=0,
        bytes_accessed=(Mp * Kp * a_p.dtype.itemsize
                        + n_b_reads * Kp * Np * b_p.dtype.itemsize
                        + Mp * Np * jnp.dtype(out_dtype).itemsize
                        + Np * 4))

    out = pl.pallas_call(
        kernel,
        out_shape=jax.ShapeDtypeStruct((Mp, Np), out_dtype),
        grid_spec=pltpu.PrefetchScalarGridSpec(
            num_scalar_prefetch=0,
            grid=grid,
            in_specs=in_specs,
            out_specs=out_specs,
            scratch_shapes=scratch,
        ),
        compiler_params=pltpu.CompilerParams(
            dimension_semantics=("parallel", "parallel", "arbitrary"),
            vmem_limit_bytes=vmem_limit),
        cost_estimate=cost,
    )(a_p, b_p, bias_p)

    return out


# ---------------------------------------------------------------------------
# GCNConv forward (PyG semantics) driving the Pallas kernels.
# ---------------------------------------------------------------------------
def _add_remaining_self_loops(src, dst, edge_weight, n, dtype):
    """PyG add_remaining_self_loops: existing self loops are replaced by a
    single self loop per node carrying the existing weight (last one wins on
    duplicates, matching PyG's index_put); other nodes get fill value 1."""
    is_loop = src == dst
    loop_w = jnp.ones((n,), dtype).at[
        jnp.where(is_loop, src, n)].set(edge_weight, mode='drop')
    # Zero out original self-loop edges (weight-0 edge contributes nothing).
    edge_weight = jnp.where(is_loop, jnp.zeros_like(edge_weight), edge_weight)
    loop = jnp.arange(n, dtype=src.dtype)
    src = jnp.concatenate([src, loop])
    dst = jnp.concatenate([dst, loop])
    edge_weight = jnp.concatenate([edge_weight, loop_w])
    return src, dst, edge_weight


def gcn_conv_pallas(x, edge_index, weight, bias, edge_weight=None,
                    add_self_loops=True, compute_dtype=jnp.bfloat16):
    """Forward of GCNConv with both matmuls in tiled Pallas TPU kernels.

    x:          [N, F_in] float32
    edge_index: [2, E]    int32, row 0 = source, row 1 = target
    weight:     [F_in, F_out]
    bias:       [F_out]
    compute_dtype: dtype of the A_hat / H HBM streams (default bfloat16;
                   f32 MXU accumulation in both cases).
    """
    n, fin = x.shape
    fout = weight.shape[1]
    src, dst = edge_index[0], edge_index[1]
    if edge_weight is None:
        edge_weight = jnp.ones((edge_index.shape[1],), dtype=x.dtype)

    if add_self_loops:
        src, dst, edge_weight = _add_remaining_self_loops(
            src, dst, edge_weight, n, x.dtype)

    # Symmetric normalization (gcn_norm): degree over target nodes (f32).
    deg = jnp.zeros((n,), x.dtype).at[dst].add(edge_weight)
    dinv = jnp.where(deg > 0, jax.lax.rsqrt(deg), jnp.zeros_like(deg))
    norm = dinv[src] * edge_weight * dinv[dst]

    vmem_limit = _vmem_limit_bytes()

    # ----- tile / padding plan (node dimension shared by both matmuls) -----
    node_tile = _pick_node_tile(n)
    n_pad = _round_up(n, node_tile)
    tk1 = min(512, _round_up(fin, 128))
    fin_pad = _round_up(fin, tk1)
    tn = min(256, _round_up(fout, 128))
    fout_pad = _round_up(fout, tn)

    # Pre-padded, pre-cast operands: built once, no extra HBM passes later.
    x_p = jnp.zeros((n_pad, fin_pad), compute_dtype).at[:n, :fin].set(
        x.astype(compute_dtype))
    w_p = jnp.zeros((fin_pad, fout_pad), compute_dtype).at[:fin, :fout].set(
        weight.astype(compute_dtype))
    bias_p = jnp.zeros((fout_pad,), jnp.float32).at[:fout].set(
        bias.astype(jnp.float32))

    # Dense normalized adjacency, built directly padded and in compute dtype:
    #   A_hat[target, source] = norm.
    # TODO(synk): for large sparse graphs replace this O(N^2) densification
    # with a sparse scalar-prefetch Pallas kernel (edges sorted by destination
    # block, per-block offsets via PrefetchScalarGridSpec, row-gather of
    # H[src] + segment-sum), bringing bytes down from ~N^2 to ~E*F_out.
    a_hat = jnp.zeros((n_pad, n_pad), compute_dtype).at[dst, src].add(
        norm.astype(compute_dtype))

    # H = X @ W, computed ONCE (hoisted out of the aggregation).
    h_p = matmul_bias_pallas(
        x_p, w_p, jnp.zeros((fout_pad,), jnp.float32),
        out_dtype=compute_dtype, tm=node_tile, tk=tk1, tn=tn,
        vmem_limit=vmem_limit)

    # OUT = A_hat @ H + bias; f32 output, accumulated directly in the output
    # block, H kept VMEM-resident when it fits.
    out_p = matmul_bias_pallas(
        a_hat, h_p, bias_p, out_dtype=jnp.float32,
        tm=node_tile, tk=node_tile, tn=tn, vmem_limit=vmem_limit)

    return out_p[:n, :fout].astype(x.dtype)


def gcn_conv_ref(x, edge_index, weight, bias, edge_weight=None):
    """Pure-JAX reference (same self-loop semantics) for a sanity check."""
    n = x.shape[0]
    src, dst = edge_index[0], edge_index[1]
    if edge_weight is None:
        edge_weight = jnp.ones((edge_index.shape[1],), dtype=x.dtype)
    src, dst, edge_weight = _add_remaining_self_loops(
        src, dst, edge_weight, n, x.dtype)
    deg = jnp.zeros((n,), x.dtype).at[dst].add(edge_weight)
    dinv = jnp.where(deg > 0, jax.lax.rsqrt(deg), 0.0)
    norm = dinv[src] * edge_weight * dinv[dst]
    h = x @ weight
    msgs = norm[:, None] * h[src]
    out = jnp.zeros((n, weight.shape[1]), x.dtype).at[dst].add(msgs)
    return out + bias[None, :]


if __name__ == "__main__":
    key = jax.random.PRNGKey(0)
    N, F_IN, F_OUT, E = 8, 16, 32, 20
    k1, k2, k3, k4 = jax.random.split(key, 4)

    x = jax.random.normal(k1, (N, F_IN), dtype=jnp.float32)
    edge_index = jax.random.randint(k2, (2, E), 0, N, dtype=jnp.int32)

    # Deterministic parameter init (GCNConv: Linear(F_in, F_out, bias=False)
    # followed by an additive bias of shape [F_out]).
    weight = jax.random.normal(k3, (F_IN, F_OUT), dtype=jnp.float32) * (
        1.0 / jnp.sqrt(jnp.float32(F_IN)))
    bias = jax.random.normal(k4, (F_OUT,), dtype=jnp.float32) * 0.01

    ref = gcn_conv_ref(x, edge_index, weight, bias)

    # f32 path (tight tolerance).
    out_f32 = jax.block_until_ready(
        gcn_conv_pallas(x, edge_index, weight, bias,
                        compute_dtype=jnp.float32))
    assert out_f32.shape == (N, F_OUT)
    assert jnp.allclose(out_f32, ref, atol=1e-4, rtol=1e-4)

    # Default bf16-stream path (halves A_hat/H HBM bytes; f32 accumulation).
    out_bf16 = jax.block_until_ready(
        gcn_conv_pallas(x, edge_index, weight, bias))
    assert out_bf16.shape == (N, F_OUT)
    assert jnp.allclose(out_bf16, ref, atol=5e-2, rtol=5e-2)

    # TODO(synk): the LRP relevance-propagation rule (autograd_fn backward) is
    # not a forward op and is not implemented here.
    print("KERNEL_OK")
</pallas_src>

<mosaic_0001>
module attributes {stable_mosaic.version = 11 : i64} {
  func.func @kernel(%arg0: i32, %arg1: i32, %arg2: i32, %arg3: memref<128x128xf32, #tpu.memory_space<vmem>>, %arg4: memref<128x128xf32, #tpu.memory_space<vmem>>, %arg5: memref<1x128xf32, #tpu.memory_space<vmem>>, %arg6: memref<128x128xf32, #tpu.memory_space<vmem>>) attributes {dimension_semantics = [#tpu.dimension_semantics<parallel>, #tpu.dimension_semantics<parallel>, #tpu.dimension_semantics<arbitrary>], iteration_bounds = array<i64: 1, 1, 1>, scalar_prefetch = 0 : i64, scratch_operands = 0 : i64, tpu.core_type = #tpu.core_type<tc>, window_params = [{transform_indices = @transform_0, window_bounds = array<i64: 128, 128>}, {pipeline_mode = #tpu.pipeline_mode<synchronous>, transform_indices = @transform_1, window_bounds = array<i64: 128, 128>}, {transform_indices = @transform_2, window_bounds = array<i64: 1, 128>}, {transform_indices = @transform_3, window_bounds = array<i64: 128, 128>}]} {
    %c128_i32 = arith.constant 128 : i32
    %0 = arith.muli %arg2, %c128_i32 : i32
    %1 = tpu.assume_multiple %0, 128 : i32
    %c128_i32_0 = arith.constant 128 : i32
    %2 = arith.muli %arg1, %c128_i32_0 : i32
    %3 = tpu.assume_multiple %2, 128 : i32
    %4 = arith.index_cast %1 : i32 to index
    %5 = arith.index_cast %3 : i32 to index
    %6 = vector.load %arg4[%4, %5] : memref<128x128xf32, #tpu.memory_space<vmem>>, vector<128x128xf32>
    %c0 = arith.constant 0 : index
    %c0_1 = arith.constant 0 : index
    %7 = vector.load %arg3[%c0, %c0_1] : memref<128x128xf32, #tpu.memory_space<vmem>>, vector<128x128xf32>
    %cst = arith.constant dense<0.000000e+00> : vector<128x128xf32>
    %8 = tpu.matmul %7, %6, %cst {dimension_numbers = #tpu.dot_dimension_numbers<[1], [0], [0], [1], [0, 0, 1, 1], [], []>} : vector<128x128xf32>, vector<128x128xf32>, vector<128x128xf32> -> vector<128x128xf32>
    %c0_i32 = arith.constant 0 : i32
    %9 = arith.cmpi eq, %arg2, %c0_i32 : i32
    %10 = arith.extui %9 : i1 to i32
    %c0_i32_2 = arith.constant 0 : i32
    %11 = arith.cmpi ne, %10, %c0_i32_2 : i32
    scf.if %11 {
      %c0_7 = arith.constant 0 : index
      %c0_8 = arith.constant 0 : index
      %15 = vector.load %arg5[%c0_7, %c0_8] : memref<1x128xf32, #tpu.memory_space<vmem>>, vector<1x128xf32>
      %16 = vector.shape_cast %15 : vector<1x128xf32> to vector<1x128xf32>
      %17 = vector.broadcast %16 : vector<1x128xf32> to vector<128x128xf32>
      %c0_9 = arith.constant 0 : index
      %c0_10 = arith.constant 0 : index
      %18 = vector.load %arg6[%c0_9, %c0_10] : memref<128x128xf32, #tpu.memory_space<vmem>>, vector<128x128xf32>
      tpu.vector_store %arg6[%c0_9, %c0_10], %17 {strides = array<i32>} : memref<128x128xf32, #tpu.memory_space<vmem>>, vector<128x128xf32>,
    } else {
    }
    %c0_3 = arith.constant 0 : index
    %c0_4 = arith.constant 0 : index
    %12 = vector.load %arg6[%c0_3, %c0_4] : memref<128x128xf32, #tpu.memory_space<vmem>>, vector<128x128xf32>
    %13 = arith.addf %12, %8 : vector<128x128xf32>
    %c0_5 = arith.constant 0 : index
    %c0_6 = arith.constant 0 : index
    %14 = vector.load %arg6[%c0_5, %c0_6] : memref<128x128xf32, #tpu.memory_space<vmem>>, vector<128x128xf32>
    tpu.vector_store %arg6[%c0_5, %c0_6], %13 {strides = array<i32>} : memref<128x128xf32, #tpu.memory_space<vmem>>, vector<128x128xf32>,
    return
  }
  func.func @transform_0(%arg0: i32, %arg1: i32, %arg2: i32) -> (i32, i32) {
    %c0_i32 = arith.constant 0 : i32
    return %arg0, %arg2 : i32, i32
  }
  func.func @transform_1(%arg0: i32, %arg1: i32, %arg2: i32) -> (i32, i32) {
    %c0_i32 = arith.constant 0 : i32
    %c0_i32_0 = arith.constant 0 : i32
    %c0_i32_1 = arith.constant 0 : i32
    return %c0_i32, %c0_i32_0 : i32, i32
  }
  func.func @transform_2(%arg0: i32, %arg1: i32, %arg2: i32) -> (i32, i32) {
    %c0_i32 = arith.constant 0 : i32
    %c0_i32_0 = arith.constant 0 : i32
    return %c0_i32, %arg1 : i32, i32
  }
  func.func @transform_3(%arg0: i32, %arg1: i32, %arg2: i32) -> (i32, i32) {
    %c0_i32 = arith.constant 0 : i32
    return %arg0, %arg1 : i32, i32
  }
}

</mosaic_0001>

<bundles_post_ra>
// kernel: tpu_custom_call.1
= control target key start
LH: loop header
LB: loop body
LE: loop exit
PB: predicated region body
PF: predicated region fallthrough
CT: control target
= control target key end

     0   :  { %8 = vsyncpa [#allocation3], 0  ;;  %s421_s0 = inlined_call_operand.hbm [shape: f32[128,128], index: 0, kind: input, shape index: {}]   ;;  %s422_s1 = inlined_call_operand.hbm [shape: f32[128,128], index: 1, kind: input, shape index: {}]   ;;  %s423_s2 = inlined_call_operand.vmem [shape: f32[1,128], index: 2, kind: input, shape index: {}]   ;;  %s424_s3 = inlined_call_operand.hbm [shape: f32[128,128], index: 3, kind: output, shape index: {}]  }
   0x1   :  { %9 = vsyncpa [#allocation6], 0 }
   0x2   :  { %10 = vsyncpa [#allocation4], 0  ;;  %s15_s14 = sshll.u32 %s421_s0, 4  ;;  %s375_s15 = smov [#allocation2]   ;;  %s16_s14 = int_to_ptr.hbm [resolvable:$true] %s15_s14 }
   0x3   :  { %s17_s16 = sshll.u32 %s375_s15, 4  ;;  %s28_s19 = sshll.u32 %s422_s1, 4  ;;  %s18_s16 = int_to_ptr.vmem [resolvable:$true] %s17_s16  ;;  %s29_s19 = int_to_ptr.hbm [resolvable:$true] %s28_s19 }
   0x4   :  { %s376_s20 = smov 128   ;;  %s377_s21 = smov 8  }
   0x5   :  { %23 = dma.hbm_to_vmem [thread:$0]  %s16_s14, 2048, %s18_s16, [#allocation3], %s376_s20, %s376_s20, %s377_s21  }
   0x6   :  { %s378_s22 = smov [#allocation5]  }
   0x7   :  { %s30_s23 = sshll.u32 %s378_s22, 4  ;;  %s31_s23 = int_to_ptr.vmem [resolvable:$true] %s30_s23 }
   0x8   :  { %36 = dma.hbm_to_vmem [thread:$0]  %s29_s19, 2048, %s31_s23, [#allocation6], %s376_s20, %s376_s20, %s377_s21  }
   0x9   :  { %369 = dma.done.wait [#allocation3], 2048  }
   0xa   :  { %370 = vsyncadd [#allocation3], 4294965248 }
   0xb   :  { %371 = dma.done.wait [#allocation6], 2048  }
   0xc   :  { %372 = vsyncadd [#allocation6], 4294965248  ;;  %v68_v0 = vld [vmem:[#allocation5 + $0x78] sm:$0xff]  ;;  %v67_v1 = vld [vmem:[#allocation5 + $0x70] sm:$0xff]  ;;  %s228_s27 = sshll.u32 %s424_s3, 4  ;;  %s229_s27 = int_to_ptr.hbm [resolvable:$true] %s228_s27 }
   0xd   :  { %244 = vmatpush.msra.mxu2 %v68_v0  ;;  %245 = vmatpush.msra.mxu3 %v68_v0  ;;  %v66_v2 = vld [vmem:[#allocation5 + $0x68] sm:$0xff]  ;;  %v65_v3 = vld [vmem:[#allocation5 + $0x60] sm:$0xff]  ;;  %v64_v4 = vld [vmem:[#allocation5 + $0x58] sm:$0xff] }
   0xe   :  { %85 = vmatpush.msra.mxu0 %v68_v0  ;;  %243 = vmatpush.msra.mxu1 %v68_v0  ;;  %v63_v5 = vld [vmem:[#allocation5 + $0x50] sm:$0xff]  ;;  %v62_v6 = vld [vmem:[#allocation5 + $0x48] sm:$0xff]  ;;  %v61_v7 = vld [vmem:[#allocation5 + $0x40] sm:$0xff] }
   0xf   :  { %247 = vmatpush.msra.mxu2 %v67_v1  ;;  %248 = vmatpush.msra.mxu3 %v67_v1  ;;  %v60_v8 = vld [vmem:[#allocation5 + $0x38] sm:$0xff]  ;;  %v59_v9 = vld [vmem:[#allocation5 + $0x30] sm:$0xff]  ;;  %v58_v10 = vld [vmem:[#allocation5 + $0x28] sm:$0xff] }
  0x10   :  { %86 = vmatpush.msra.mxu0 %v67_v1  ;;  %246 = vmatpush.msra.mxu1 %v67_v1  ;;  %v57_v11 = vld [vmem:[#allocation5 + $0x20] sm:$0xff]  ;;  %v56_v12 = vld [vmem:[#allocation5 + $0x18] sm:$0xff]  ;;  %v55_v13 = vld [vmem:[#allocation5 + $0x10] sm:$0xff] }
  0x11   :  { %250 = vmatpush.msra.mxu2 %v66_v2  ;;  %251 = vmatpush.msra.mxu3 %v66_v2  ;;  %v54_v14 = vld [vmem:[#allocation5 + $0x8] sm:$0xff]  ;;  %v53_v15 = vld [vmem:[#allocation5] sm:$0xff]  ;;  %v79_v24 = vld [vmem:[#allocation2 + $0x50] sm:$0xff] }
  0x12   :  { %87 = vmatpush.msra.mxu0 %v66_v2  ;;  %249 = vmatpush.msra.mxu1 %v66_v2  ;;  %v77_v16 = vld [vmem:[#allocation2 + $0x40] sm:$0xff]  ;;  %v78_v20 = vld [vmem:[#allocation2 + $0x48] sm:$0xff]  ;;  %v83_v25 = vld [vmem:[#allocation2 + $0x70] sm:$0xff] }
  0x13   :  { %253 = vmatpush.msra.mxu2 %v65_v3  ;;  %254 = vmatpush.msra.mxu3 %v65_v3  ;;  %v81_v17 = vld [vmem:[#allocation2 + $0x60] sm:$0xff]  ;;  %v82_v21 = vld [vmem:[#allocation2 + $0x68] sm:$0xff]  ;;  %v71_v26 = vld [vmem:[#allocation2 + $0x10] sm:$0xff] }
  0x14   :  { %88 = vmatpush.msra.mxu0 %v65_v3  ;;  %252 = vmatpush.msra.mxu1 %v65_v3  ;;  %v69_v18 = vld [vmem:[#allocation2] sm:$0xff]  ;;  %v70_v22 = vld [vmem:[#allocation2 + $0x8] sm:$0xff]  ;;  %v75_v27 = vld [vmem:[#allocation2 + $0x30] sm:$0xff] }
  0x15   :  { %256 = vmatpush.msra.mxu2 %v64_v4  ;;  %257 = vmatpush.msra.mxu3 %v64_v4  ;;  %v73_v19 = vld [vmem:[#allocation2 + $0x20] sm:$0xff]  ;;  %v74_v23 = vld [vmem:[#allocation2 + $0x28] sm:$0xff]  ;;  %v80_v28 = vld [vmem:[#allocation2 + $0x58] sm:$0xff] }
  0x16   :  { %89 = vmatpush.msra.mxu0 %v64_v4  ;;  %255 = vmatpush.msra.mxu1 %v64_v4  ;;  %v84_v29 = vld [vmem:[#allocation2 + $0x78] sm:$0xff]  ;;  %v296_v32 = vld [vmem:[%s423_s2] ss:$0 sm:$0xff]  ;;  %s379_s2 = smov [#allocation7]  }
  0x17   :  { %259 = vmatpush.msra.mxu2 %v63_v5  ;;  %260 = vmatpush.msra.mxu3 %v63_v5  ;;  %v72_v30 = vld [vmem:[#allocation2 + $0x18] sm:$0xff]  ;;  %s226_s24 = sshll.u32 %s379_s2, 4  ;;  %s227_s24 = int_to_ptr.vmem [resolvable:$true] %s226_s24 }
  0x18   :  { %90 = vmatpush.msra.mxu0 %v63_v5  ;;  %258 = vmatpush.msra.mxu1 %v63_v5  ;;  %v76_v31 = vld [vmem:[#allocation2 + $0x38] sm:$0xff] }
  0x19   :  { %262 = vmatpush.msra.mxu2 %v62_v6  ;;  %263 = vmatpush.msra.mxu3 %v62_v6 }
  0x1a   :  { %91 = vmatpush.msra.mxu0 %v62_v6  ;;  %261 = vmatpush.msra.mxu1 %v62_v6 }
  0x1b   :  { %265 = vmatpush.msra.mxu2 %v61_v7  ;;  %266 = vmatpush.msra.mxu3 %v61_v7 }
  0x1c   :  { %92 = vmatpush.msra.mxu0 %v61_v7  ;;  %264 = vmatpush.msra.mxu1 %v61_v7 }
  0x1d   :  { %268 = vmatpush.msra.mxu2 %v60_v8  ;;  %269 = vmatpush.msra.mxu3 %v60_v8 }
  0x1e   :  { %93 = vmatpush.msra.mxu0 %v60_v8  ;;  %267 = vmatpush.msra.mxu1 %v60_v8 }
  0x1f   :  { %271 = vmatpush.msra.mxu2 %v59_v9  ;;  %272 = vmatpush.msra.mxu3 %v59_v9 }
  0x20   :  { %94 = vmatpush.msra.mxu0 %v59_v9  ;;  %270 = vmatpush.msra.mxu1 %v59_v9 }
  0x21   :  { %274 = vmatpush.msra.mxu2 %v58_v10  ;;  %275 = vmatpush.msra.mxu3 %v58_v10 }
  0x22   :  { %95 = vmatpush.msra.mxu0 %v58_v10  ;;  %273 = vmatpush.msra.mxu1 %v58_v10 }
  0x23   :  { %277 = vmatpush.msra.mxu2 %v57_v11  ;;  %278 = vmatpush.msra.mxu3 %v57_v11 }
  0x24   :  { %96 = vmatpush.msra.mxu0 %v57_v11  ;;  %276 = vmatpush.msra.mxu1 %v57_v11 }
  0x25   :  { %280 = vmatpush.msra.mxu2 %v56_v12  ;;  %281 = vmatpush.msra.mxu3 %v56_v12 }
  0x26   :  { %97 = vmatpush.msra.mxu0 %v56_v12  ;;  %279 = vmatpush.msra.mxu1 %v56_v12 }
  0x27   :  { %283 = vmatpush.msra.mxu2 %v55_v13  ;;  %284 = vmatpush.msra.mxu3 %v55_v13 }
  0x28   :  { %98 = vmatpush.msra.mxu0 %v55_v13  ;;  %282 = vmatpush.msra.mxu1 %v55_v13 }
  0x29   :  { %286 = vmatpush.msra.mxu2 %v54_v14  ;;  %287 = vmatpush.msra.mxu3 %v54_v14 }
  0x2a   :  { %99 = vmatpush.msra.mxu0 %v54_v14  ;;  %285 = vmatpush.msra.mxu1 %v54_v14 }
  0x2b   :  { %289 = vmatpush.msra.mxu2 %v53_v15  ;;  %290 = vmatpush.msra.mxu3 %v53_v15 }
  0x2c   :  { %125 = vmatmul.f32.vlgmr.msra.gmra.mxu2 %v77_v16  ;;  %137 = vmatmul.f32.vlgmr.msra.gmra.mxu3 %v81_v17 }
  0x2d   :  { %100 = vmatpush.msra.mxu0 %v53_v15  ;;  %288 = vmatpush.msra.mxu1 %v53_v15 }
  0x2e   :  { %101 = vmatmul.f32.vlgmr.msra.gmra.mxu0 %v69_v18  ;;  %113 = vmatmul.f32.vlgmr.msra.gmra.mxu1 %v73_v19 }
  0x34   :  { %128 = vmatmul.f32.gmra.mxu2 %v78_v20  ;;  %140 = vmatmul.f32.gmra.mxu3 %v82_v21 }
  0x36   :  { %104 = vmatmul.f32.gmra.mxu0 %v70_v22  ;;  %116 = vmatmul.f32.gmra.mxu1 %v74_v23 }
  0x3c   :  { %131 = vmatmul.f32.gmra.mxu2 %v79_v24  ;;  %143 = vmatmul.f32.gmra.mxu3 %v83_v25 }
  0x3e   :  { %107 = vmatmul.f32.gmra.mxu0 %v71_v26  ;;  %119 = vmatmul.f32.gmra.mxu1 %v75_v27 }
  0x44   :  { %134 = vmatmul.f32.gmra.mxu2 %v80_v28  ;;  %146 = vmatmul.f32.gmra.mxu3 %v84_v29 }
  0x46   :  { %110 = vmatmul.f32.gmra.mxu0 %v72_v30  ;;  %122 = vmatmul.f32.gmra.mxu1 %v76_v31 }
  0xab   :  { %v102_v33 = vpop.f32.mrf.mxu0  ;;  %v114_v34 = vpop.f32.mrf.mxu1 }
  0xac   :  { %v190_v35 = vadd.f32 %v296_v32, %v102_v33  ;;  %v194_v36 = vadd.f32 %v296_v32, %v114_v34 }
  0xae   :  { %206 = vst [vmem:[#allocation7] sm:$0xff] %v190_v35 }
  0xaf   :  { %210 = vst [vmem:[#allocation7 + $0x20] sm:$0xff] %v194_v36  ;;  %v126_v37 = vpop.f32.mrf.mxu2  ;;  %v138_v38 = vpop.f32.mrf.mxu3 }
  0xb0   :  { %v198_v39 = vadd.f32 %v296_v32, %v126_v37  ;;  %v202_v40 = vadd.f32 %v296_v32, %v138_v38 }
  0xb2   :  { %214 = vst [vmem:[#allocation7 + $0x40] sm:$0xff] %v198_v39 }
  0xb3   :  { %218 = vst [vmem:[#allocation7 + $0x60] sm:$0xff] %v202_v40  ;;  %v105_v41 = vpop.f32.mrf.mxu0  ;;  %v117_v42 = vpop.f32.mrf.mxu1 }
  0xb4   :  { %v191_v43 = vadd.f32 %v296_v32, %v105_v41  ;;  %v195_v44 = vadd.f32 %v296_v32, %v117_v42 }
  0xb6   :  { %207 = vst [vmem:[#allocation7 + $0x8] sm:$0xff] %v191_v43 }
  0xb7   :  { %211 = vst [vmem:[#allocation7 + $0x28] sm:$0xff] %v195_v44  ;;  %v129_v45 = vpop.f32.mrf.mxu2  ;;  %v141_v46 = vpop.f32.mrf.mxu3 }
  0xb8   :  { %v199_v47 = vadd.f32 %v296_v32, %v129_v45  ;;  %v203_v48 = vadd.f32 %v296_v32, %v141_v46 }
  0xba   :  { %215 = vst [vmem:[#allocation7 + $0x48] sm:$0xff] %v199_v47 }
  0xbb   :  { %219 = vst [vmem:[#allocation7 + $0x68] sm:$0xff] %v203_v48  ;;  %v108_v49 = vpop.f32.mrf.mxu0  ;;  %v120_v50 = vpop.f32.mrf.mxu1 }
  0xbc   :  { %v192_v51 = vadd.f32 %v296_v32, %v108_v49  ;;  %v196_v52 = vadd.f32 %v296_v32, %v120_v50 }
  0xbe   :  { %208 = vst [vmem:[#allocation7 + $0x10] sm:$0xff] %v192_v51 }
  0xbf   :  { %212 = vst [vmem:[#allocation7 + $0x30] sm:$0xff] %v196_v52  ;;  %v132_v53 = vpop.f32.mrf.mxu2  ;;  %v144_v54 = vpop.f32.mrf.mxu3 }
  0xc0   :  { %v200_v55 = vadd.f32 %v296_v32, %v132_v53  ;;  %v204_v56 = vadd.f32 %v296_v32, %v144_v54 }
  0xc2   :  { %216 = vst [vmem:[#allocation7 + $0x50] sm:$0xff] %v200_v55 }
  0xc3   :  { %220 = vst [vmem:[#allocation7 + $0x70] sm:$0xff] %v204_v56  ;;  %v111_v57 = vpop.f32.mrf.mxu0  ;;  %v123_v58 = vpop.f32.mrf.mxu1 }
  0xc4   :  { %v193_v59 = vadd.f32 %v296_v32, %v111_v57  ;;  %v197_v60 = vadd.f32 %v296_v32, %v123_v58 }
  0xc6   :  { %209 = vst [vmem:[#allocation7 + $0x18] sm:$0xff] %v193_v59 }
  0xc7   :  { %213 = vst [vmem:[#allocation7 + $0x38] sm:$0xff] %v197_v60  ;;  %v135_v61 = vpop.f32.mrf.mxu2  ;;  %v147_v62 = vpop.f32.mrf.mxu3 }
  0xc8   :  { %v201_v63 = vadd.f32 %v296_v32, %v135_v61  ;;  %v205_v0 = vadd.f32 %v296_v32, %v147_v62 }
  0xca   :  { %217 = vst [vmem:[#allocation7 + $0x58] sm:$0xff] %v201_v63 }
  0xcb   :  { %221 = vst [vmem:[#allocation7 + $0x78] sm:$0xff] %v205_v0 }
  0xcc   :  { %234 = dma.vmem_to_hbm [thread:$0]  %s227_s24, 2048, %s229_s27, [#allocation4], %s376_s20, %s376_s20, %s377_s21  }
  0xcd   :  { %373 = dma.done.wait [#allocation4], 2048  }
  0xce   :  { %374 = vsyncadd [#allocation4], 4294965248 }
  0xcf   :  { %239 = vsyncpa [#allocation3], 1 }
  0xd0   :  { %240 = vsyncpa [#allocation6], 1 }
  0xd1   :  { %241 = vsyncpa [#allocation4], 1 }

</bundles_post_ra>
